<compile_context>
chip_gen: v5e
topology: v5e:2x2
jax: 0.10.0
libtpu: 0.0.40
codegen_flags: <defaults>
</compile_context>

<pallas_src>
import jax
import jax.numpy as jnp
from jax import lax
from jax.experimental import pallas as pl
from jax.experimental.pallas import tpu as pltpu


def _round_up(x, m):
    return ((x + m - 1) // m) * m


def _pick_tile(n_pad, candidates=(512, 256, 128)):
    for t in candidates:
        if n_pad % t == 0:
            return t
    return 128


def _kv_proj_kernel(x_ref, wk_ref, bk_ref, wv_ref, bv_ref, k_out_ref, v_out_ref):
    """1x1-conv K/V projections for one (batch, spatial-tile) grid step.

    x_ref    : (1, C, TN) f32 input tile (channel-major)
    wk       : (Cqp, C) bf16 (zero-padded rows), bk : (Cqp, 1) f32
    wv       : (C, C)  bf16,                     bv : (C, 1)  f32
    k_out    : (1, Cqp, TN) bf16
    v_out    : (1, C, TN)  bf16
    """
    x = x_ref[0].astype(jnp.bfloat16)                                   # (C, TN)
    k = jnp.dot(wk_ref[...], x, preferred_element_type=jnp.float32) + bk_ref[...]
    v = jnp.dot(wv_ref[...], x, preferred_element_type=jnp.float32) + bv_ref[...]
    k_out_ref[0] = k.astype(jnp.bfloat16)
    v_out_ref[0] = v.astype(jnp.bfloat16)


def _make_flash_kernel(n_valid, tk, masked):
    """Flash-attention kernel for one (batch, q-tile, kv-tile) grid step."""

    def kernel(x_q_ref, k_ref, v_ref, wq_ref, bq_ref, gamma_ref, out_ref,
               q_scr, m_scr, l_scr, acc_scr):
        ki = pl.program_id(2)
        nk = pl.num_programs(2)

        @pl.when(ki == 0)
        def _init():
            x_q = x_q_ref[0].astype(jnp.bfloat16)                       # (C, TQ)
            q = jnp.dot(wq_ref[...], x_q,
                        preferred_element_type=jnp.float32) + bq_ref[...]
            q_scr[...] = q.astype(jnp.bfloat16)                         # (Cqp, TQ)
            m_scr[...] = jnp.full(m_scr.shape, -jnp.inf, jnp.float32)
            l_scr[...] = jnp.zeros(l_scr.shape, jnp.float32)
            acc_scr[...] = jnp.zeros(acc_scr.shape, jnp.float32)

        k = k_ref[0]                                                    # (Cqp, TK) bf16
        v = v_ref[0]                                                    # (C, TK)  bf16

        # energy^T[j, i] = k_j . q_i : contract the (padded) Cq channel dim of
        # both operands directly (transposed-lhs matmul; no explicit .T).
        s = lax.dot_general(k, q_scr[...], (((0,), (0,)), ((), ())),
                            preferred_element_type=jnp.float32)         # (TK, TQ)

        if masked:  # static: only traced when N was padded up to N_pad
            pos = ki * tk + lax.broadcasted_iota(jnp.int32, (tk, 1), 0)
            s = jnp.where(pos < n_valid, s, -jnp.inf)

        # Online softmax (f32).  Stats live along lanes -> broadcasts are free.
        m_prev = m_scr[...]                                             # (1, TQ)
        m_new = jnp.maximum(m_prev, jnp.max(s, axis=0, keepdims=True))  # (1, TQ)
        alpha = jnp.exp(m_prev - m_new)                                 # (1, TQ)
        p = jnp.exp(s - m_new)                                          # (TK, TQ); s dead after this

        l_scr[...] = alpha * l_scr[...] + jnp.sum(p, axis=0, keepdims=True)
        acc_scr[...] = alpha * acc_scr[...] + jnp.dot(
            v, p.astype(jnp.bfloat16), preferred_element_type=jnp.float32)  # (C, TQ)
        m_scr[...] = m_new

        @pl.when(ki == nk - 1)
        def _finalize():
            inv_l = pl.reciprocal(l_scr[...], approx=True)              # (1, TQ)
            out_ref[0] = (gamma_ref[0, 0] * (acc_scr[...] * inv_l)
                          + x_q_ref[0].astype(jnp.float32)).astype(out_ref.dtype)

    return kernel


def self_attn(x_nchw, wq, bq, wk, bk, wv, bv, gamma, *, tq=None, tk=None):
    """SAGAN self-attention forward (with_attn=False path).

    x_nchw : (B, C, W, H) float32
    wq, wk : (Cq, C) with Cq = C // 8       bq, bk : (Cq,)
    wv     : (C, C)                          bv     : (C,)
    gamma  : (1,) scalar
    Returns (B, C, W, H).
    """
    B, C, W, H = x_nchw.shape
    N = W * H
    Cq = wq.shape[0]

    # Spatial padding to a multiple of 128 keeps every tile (8,128)-aligned and
    # the output lane-dense; padded keys are masked inside the kernel.
    N_pad = _round_up(N, 128)
    TQ = tq if tq is not None else _pick_tile(N_pad)
    TK = tk if tk is not None else _pick_tile(N_pad)
    # v7x megacore: keep at least 2 parallel (batch x q-tile) programs.
    if tq is None and B == 1 and N_pad // TQ < 2 and N_pad > 128:
        TQ = _pick_tile(N_pad, candidates=tuple(t for t in (256, 128) if t < TQ))
    assert N_pad % TQ == 0 and N_pad % TK == 0, (N_pad, TQ, TK)
    masked = N_pad != N

    # Pad the q/k projection depth only to the bf16 sublane tile (16); zero
    # rows of q and k contribute nothing to q.k, so the energy is unchanged.
    Cqp = max(16, _round_up(Cq, 16))

    wq_p = jnp.zeros((Cqp, C), jnp.bfloat16).at[:Cq].set(wq.astype(jnp.bfloat16))
    wk_p = jnp.zeros((Cqp, C), jnp.bfloat16).at[:Cq].set(wk.astype(jnp.bfloat16))
    bq_p = jnp.zeros((Cqp, 1), jnp.float32).at[:Cq, 0].set(bq.astype(jnp.float32))
    bk_p = jnp.zeros((Cqp, 1), jnp.float32).at[:Cq, 0].set(bk.astype(jnp.float32))
    wv_b = wv.astype(jnp.bfloat16)
    bv_c = bv.reshape(C, 1).astype(jnp.float32)
    gamma_s = jnp.asarray(gamma, jnp.float32).reshape(1, 1)

    # Native NCHW flattening: (B, C, W, H) -> (B, C, N).  No transposes.
    x_flat = x_nchw.reshape(B, C, N)
    if masked:
        x_flat = jnp.pad(x_flat, ((0, 0), (0, 0), (0, N_pad - N)))

    # ---- pass 1: K/V projections, computed once per batch ------------------
    TN = TK
    k_proj, v_proj = pl.pallas_call(
        _kv_proj_kernel,
        out_shape=(jax.ShapeDtypeStruct((B, Cqp, N_pad), jnp.bfloat16),
                   jax.ShapeDtypeStruct((B, C, N_pad), jnp.bfloat16)),
        grid=(B, N_pad // TN),
        in_specs=[
            pl.BlockSpec((1, C, TN), lambda b, n: (b, 0, n)),   # x tile
            pl.BlockSpec((Cqp, C), lambda b, n: (0, 0)),        # Wk (padded)
            pl.BlockSpec((Cqp, 1), lambda b, n: (0, 0)),        # bk (padded)
            pl.BlockSpec((C, C), lambda b, n: (0, 0)),          # Wv
            pl.BlockSpec((C, 1), lambda b, n: (0, 0)),          # bv
        ],
        out_specs=(pl.BlockSpec((1, Cqp, TN), lambda b, n: (b, 0, n)),
                   pl.BlockSpec((1, C, TN), lambda b, n: (b, 0, n))),
        compiler_params=pltpu.CompilerParams(
            dimension_semantics=("parallel", "parallel")),
    )(x_flat, wk_p, bk_p, wv_b, bv_c)

    # ---- pass 2: flash attention + gamma * out + x residual ----------------
    grid = (B, N_pad // TQ, N_pad // TK)

    # VMEM budget: double-buffered blocks, persistent scratch, plus the
    # (TK, TQ) f32 softmax intermediates (s, p) and the bf16 copy of p.
    blk_bytes = (
        2 * C * TQ * 4                      # x_q (f32, double-buffered)
        + 2 * Cqp * TK * 2                  # K tile (bf16)
        + 2 * C * TK * 2                    # V tile (bf16)
        + 2 * C * TQ * 4                    # out
        + 2 * (Cqp * C * 2 + Cqp * 128 * 4)  # Wq + bq (lane-padded)
        + Cqp * TQ * 2                      # q scratch
        + 2 * 8 * TQ * 4                    # m, l scratch (8-sublane padded)
        + C * TQ * 4                        # acc scratch
        + 2 * TK * TQ * 4 + TK * TQ * 2     # s, p (f32) + p (bf16)
    )
    vmem_limit = int(min(64 * 1024 * 1024, max(32 * 1024 * 1024, 2 * blk_bytes)))

    kernel = _make_flash_kernel(N, TK, masked)

    out_flat = pl.pallas_call(
        kernel,
        out_shape=jax.ShapeDtypeStruct((B, C, N_pad), x_nchw.dtype),
        grid=grid,
        in_specs=[
            pl.BlockSpec((1, C, TQ), lambda b, qi, ki: (b, 0, qi)),    # x (queries + residual)
            pl.BlockSpec((1, Cqp, TK), lambda b, qi, ki: (b, 0, ki)),  # K (bf16, precomputed)
            pl.BlockSpec((1, C, TK), lambda b, qi, ki: (b, 0, ki)),    # V (bf16, precomputed)
            pl.BlockSpec((Cqp, C), lambda b, qi, ki: (0, 0)),          # Wq (padded)
            pl.BlockSpec((Cqp, 1), lambda b, qi, ki: (0, 0)),          # bq (padded)
            pl.BlockSpec(memory_space=pltpu.MemorySpace.SMEM),         # gamma
        ],
        out_specs=pl.BlockSpec((1, C, TQ), lambda b, qi, ki: (b, 0, qi)),
        scratch_shapes=[
            pltpu.VMEM((Cqp, TQ), jnp.bfloat16),   # projected q for current q-tile
            pltpu.VMEM((1, TQ), jnp.float32),      # m (running max)
            pltpu.VMEM((1, TQ), jnp.float32),      # l (running denominator)
            pltpu.VMEM((C, TQ), jnp.float32),      # output accumulator
        ],
        compiler_params=pltpu.CompilerParams(
            dimension_semantics=("parallel", "parallel", "arbitrary"),
            vmem_limit_bytes=vmem_limit),
    )(x_flat, k_proj, v_proj, wq_p, bq_p, gamma_s)

    if masked:
        out_flat = out_flat[:, :, :N]
    return out_flat.reshape(B, C, W, H)


def self_attn_reference(x_nchw, wq, bq, wk, bk, wv, bv, gamma):
    """Pure-JAX f32 reference mirroring the PyTorch forward."""
    B, C, W, H = x_nchw.shape
    N = W * H
    x = x_nchw.reshape(B, C, N)                                      # (B, C, N)
    q = jnp.einsum("oc,bcn->bon", wq, x) + bq[None, :, None]         # (B, Cq, N)
    k = jnp.einsum("oc,bcn->bon", wk, x) + bk[None, :, None]         # (B, Cq, N)
    v = jnp.einsum("oc,bcn->bon", wv, x) + bv[None, :, None]         # (B, C, N)
    energy = jnp.einsum("bci,bcj->bij", q, k)                        # energy[i,j]=q_i.k_j
    attn = jax.nn.softmax(energy, axis=-1)
    out = jnp.einsum("bcj,bij->bci", v, attn)                        # (B, C, N)
    res = gamma[0] * out + x
    return res.reshape(B, C, W, H)


if __name__ == "__main__":
    def _run_case(key, B, C, W, H, tq=None, tk=None):
        Cq = C // 8
        kx, kq, kbq, kk, kbk, kv_, kbv, kg = jax.random.split(key, 8)
        x = jax.random.normal(kx, (B, C, W, H), dtype=jnp.float32)
        # 1x1 conv params in (out_channels, in_channels) matrix form.  gamma
        # is drawn nonzero so the attention path is actually exercised (the
        # module initializes it to 0).
        wq = jax.random.normal(kq, (Cq, C), dtype=jnp.float32) * 0.1
        bq = jax.random.normal(kbq, (Cq,), dtype=jnp.float32) * 0.1
        wk = jax.random.normal(kk, (Cq, C), dtype=jnp.float32) * 0.1
        bk = jax.random.normal(kbk, (Cq,), dtype=jnp.float32) * 0.1
        wv = jax.random.normal(kv_, (C, C), dtype=jnp.float32) * 0.1
        bv = jax.random.normal(kbv, (C,), dtype=jnp.float32) * 0.1
        gamma = jax.random.normal(kg, (1,), dtype=jnp.float32)

        out = self_attn(x, wq, bq, wk, bk, wv, bv, gamma, tq=tq, tk=tk)
        out = jax.block_until_ready(out)
        ref = self_attn_reference(x, wq, bq, wk, bk, wv, bv, gamma)
        assert out.shape == (B, C, W, H)
        max_err = float(jnp.max(jnp.abs(out - ref)))
        # bf16 matmul operands + approximate reciprocal -> relaxed tolerance
        # (intentional; use approx=False for exact parity with f32 reference).
        assert jnp.allclose(out, ref, atol=2e-2, rtol=2e-2), (
            f"mismatch vs reference (max abs err {max_err:.3e})")

    key = jax.random.PRNGKey(0)
    k1, k2 = jax.random.split(key)
    # Case 1: N = 256 with 128-wide tiles -> 2 query tiles x 2 kv tiles per
    # batch, exercising the online-softmax accumulation across kv tiles.
    _run_case(k1, B=2, C=16, W=16, H=16, tq=128, tk=128)
    # Case 2: N = 144 padded to 256 -> exercises the padded-key masking path.
    _run_case(k2, B=2, C=16, W=12, H=12, tq=128, tk=128)

    print("KERNEL_OK")
</pallas_src>

<mosaic_0001>
module attributes {stable_mosaic.version = 11 : i64} {
  func.func @_kv_proj_kernel(%arg0: i32, %arg1: i32, %arg2: memref<1x16x128xf32, #tpu.memory_space<vmem>>, %arg3: memref<16x16xbf16, #tpu.memory_space<vmem>>, %arg4: memref<16x1xf32, #tpu.memory_space<vmem>>, %arg5: memref<16x16xbf16, #tpu.memory_space<vmem>>, %arg6: memref<16x1xf32, #tpu.memory_space<vmem>>, %arg7: memref<1x16x128xbf16, #tpu.memory_space<vmem>>, %arg8: memref<1x16x128xbf16, #tpu.memory_space<vmem>>) attributes {dimension_semantics = [#tpu.dimension_semantics<parallel>, #tpu.dimension_semantics<parallel>], iteration_bounds = array<i64: 2, 2>, scalar_prefetch = 0 : i64, scratch_operands = 0 : i64, tpu.core_type = #tpu.core_type<tc>, window_params = [{transform_indices = @transform_0, window_bounds = array<i64: 1, 16, 128>}, {pipeline_mode = #tpu.pipeline_mode<synchronous>, transform_indices = @transform_1, window_bounds = array<i64: 16, 16>}, {pipeline_mode = #tpu.pipeline_mode<synchronous>, transform_indices = @transform_2, window_bounds = array<i64: 16, 1>}, {pipeline_mode = #tpu.pipeline_mode<synchronous>, transform_indices = @transform_3, window_bounds = array<i64: 16, 16>}, {pipeline_mode = #tpu.pipeline_mode<synchronous>, transform_indices = @transform_4, window_bounds = array<i64: 16, 1>}, {transform_indices = @transform_5, window_bounds = array<i64: 1, 16, 128>}, {transform_indices = @transform_6, window_bounds = array<i64: 1, 16, 128>}]} {
    %c0 = arith.constant 0 : index
    %c0_0 = arith.constant 0 : index
    %c0_1 = arith.constant 0 : index
    %0 = vector.load %arg2[%c0, %c0_0, %c0_1] : memref<1x16x128xf32, #tpu.memory_space<vmem>>, vector<1x16x128xf32>
    %1 = vector.shape_cast %0 : vector<1x16x128xf32> to vector<16x128xf32>
    %2 = arith.truncf %1 : vector<16x128xf32> to vector<16x128xbf16>
    %c0_2 = arith.constant 0 : index
    %c0_3 = arith.constant 0 : index
    %3 = vector.load %arg3[%c0_2, %c0_3] : memref<16x16xbf16, #tpu.memory_space<vmem>>, vector<16x16xbf16>
    %cst = arith.constant dense<0.000000e+00> : vector<16x128xf32>
    %4 = tpu.matmul %3, %2, %cst {dimension_numbers = #tpu.dot_dimension_numbers<[1], [0], [0], [1], [0, 0, 1, 1], [], []>} : vector<16x16xbf16>, vector<16x128xbf16>, vector<16x128xf32> -> vector<16x128xf32>
    %c0_4 = arith.constant 0 : index
    %c0_5 = arith.constant 0 : index
    %5 = vector.load %arg4[%c0_4, %c0_5] : memref<16x1xf32, #tpu.memory_space<vmem>>, vector<16x1xf32>
    %6 = vector.broadcast %5 : vector<16x1xf32> to vector<16x128xf32>
    %7 = arith.addf %4, %6 : vector<16x128xf32>
    %c0_6 = arith.constant 0 : index
    %c0_7 = arith.constant 0 : index
    %8 = vector.load %arg5[%c0_6, %c0_7] : memref<16x16xbf16, #tpu.memory_space<vmem>>, vector<16x16xbf16>
    %cst_8 = arith.constant dense<0.000000e+00> : vector<16x128xf32>
    %9 = tpu.matmul %8, %2, %cst_8 {dimension_numbers = #tpu.dot_dimension_numbers<[1], [0], [0], [1], [0, 0, 1, 1], [], []>} : vector<16x16xbf16>, vector<16x128xbf16>, vector<16x128xf32> -> vector<16x128xf32>
    %c0_9 = arith.constant 0 : index
    %c0_10 = arith.constant 0 : index
    %10 = vector.load %arg6[%c0_9, %c0_10] : memref<16x1xf32, #tpu.memory_space<vmem>>, vector<16x1xf32>
    %11 = vector.broadcast %10 : vector<16x1xf32> to vector<16x128xf32>
    %12 = arith.addf %9, %11 : vector<16x128xf32>
    %13 = arith.truncf %7 : vector<16x128xf32> to vector<16x128xbf16>
    %c0_11 = arith.constant 0 : index
    %c0_12 = arith.constant 0 : index
    %c0_13 = arith.constant 0 : index
    %14 = vector.load %arg7[%c0_11, %c0_12, %c0_13] : memref<1x16x128xbf16, #tpu.memory_space<vmem>>, vector<1x16x128xbf16>
    %15 = vector.shape_cast %14 : vector<1x16x128xbf16> to vector<16x128xbf16>
    %16 = vector.shape_cast %13 : vector<16x128xbf16> to vector<1x16x128xbf16>
    tpu.vector_store %arg7[%c0_11, %c0_12, %c0_13], %16 {strides = array<i32>} : memref<1x16x128xbf16, #tpu.memory_space<vmem>>, vector<1x16x128xbf16>,
    %17 = arith.truncf %12 : vector<16x128xf32> to vector<16x128xbf16>
    %c0_14 = arith.constant 0 : index
    %c0_15 = arith.constant 0 : index
    %c0_16 = arith.constant 0 : index
    %18 = vector.load %arg8[%c0_14, %c0_15, %c0_16] : memref<1x16x128xbf16, #tpu.memory_space<vmem>>, vector<1x16x128xbf16>
    %19 = vector.shape_cast %18 : vector<1x16x128xbf16> to vector<16x128xbf16>
    %20 = vector.shape_cast %17 : vector<16x128xbf16> to vector<1x16x128xbf16>
    tpu.vector_store %arg8[%c0_14, %c0_15, %c0_16], %20 {strides = array<i32>} : memref<1x16x128xbf16, #tpu.memory_space<vmem>>, vector<1x16x128xbf16>,
    return
  }
  func.func @transform_0(%arg0: i32, %arg1: i32) -> (i32, i32, i32) {
    %c0_i32 = arith.constant 0 : i32
    %c0_i32_0 = arith.constant 0 : i32
    return %arg0, %c0_i32, %arg1 : i32, i32, i32
  }
  func.func @transform_1(%arg0: i32, %arg1: i32) -> (i32, i32) {
    %c0_i32 = arith.constant 0 : i32
    %c0_i32_0 = arith.constant 0 : i32
    %c0_i32_1 = arith.constant 0 : i32
    return %c0_i32, %c0_i32_0 : i32, i32
  }
  func.func @transform_2(%arg0: i32, %arg1: i32) -> (i32, i32) {
    %c0_i32 = arith.constant 0 : i32
    %c0_i32_0 = arith.constant 0 : i32
    %c0_i32_1 = arith.constant 0 : i32
    return %c0_i32, %c0_i32_0 : i32, i32
  }
  func.func @transform_3(%arg0: i32, %arg1: i32) -> (i32, i32) {
    %c0_i32 = arith.constant 0 : i32
    %c0_i32_0 = arith.constant 0 : i32
    %c0_i32_1 = arith.constant 0 : i32
    return %c0_i32, %c0_i32_0 : i32, i32
  }
  func.func @transform_4(%arg0: i32, %arg1: i32) -> (i32, i32) {
    %c0_i32 = arith.constant 0 : i32
    %c0_i32_0 = arith.constant 0 : i32
    %c0_i32_1 = arith.constant 0 : i32
    return %c0_i32, %c0_i32_0 : i32, i32
  }
  func.func @transform_5(%arg0: i32, %arg1: i32) -> (i32, i32, i32) {
    %c0_i32 = arith.constant 0 : i32
    %c0_i32_0 = arith.constant 0 : i32
    return %arg0, %c0_i32, %arg1 : i32, i32, i32
  }
  func.func @transform_6(%arg0: i32, %arg1: i32) -> (i32, i32, i32) {
    %c0_i32 = arith.constant 0 : i32
    %c0_i32_0 = arith.constant 0 : i32
    return %arg0, %c0_i32, %arg1 : i32, i32, i32
  }
}

</mosaic_0001>

<bundles_post_ra>
// kernel: tpu_custom_call.1
= control target key start
LH: loop header
LB: loop body
LE: loop exit
PB: predicated region body
PF: predicated region fallthrough
CT: control target
= control target key end

     0   :  { %12 = vsyncpa [#allocation3], 0  ;;  %s1072_s0 = inlined_call_operand.hbm [shape: f32[2,16,256], index: 0, kind: input, shape index: {}]   ;;  %s1073_s1 = inlined_call_operand.vmem [shape: bf16[16,16], index: 1, kind: input, shape index: {}]   ;;  %s1074_s2 = inlined_call_operand.vmem [shape: f32[16,1], index: 2, kind: input, shape index: {}]   ;;  %s1075_s3 = inlined_call_operand.vmem [shape: bf16[16,16], index: 3, kind: input, shape index: {}]   ;;  %s1076_s4 = inlined_call_operand.vmem [shape: f32[16,1], index: 4, kind: input, shape index: {}]   ;;  %s1077_s5 = inlined_call_operand.hbm [shape: bf16[2,16,256], index: 5, kind: output, shape index: {0}]   ;;  %s1078_s6 = inlined_call_operand.hbm [shape: bf16[2,16,256], index: 6, kind: output, shape index: {1}]  }
   0x1   :  { %14 = vsyncpa [#allocation3 + $0x1], 0 }
   0x2   :  { %15 = vsyncpa [#allocation4], 0 }
   0x3   :  { %17 = vsyncpa [#allocation4 + $0x1], 0 }
   0x4   :  { %18 = vsyncpa [#allocation7], 0 }
   0x5   :  { %20 = vsyncpa [#allocation7 + $0x1], 0  ;;  %s887_s21 = smov 0   ;;  %s889_s22 = smov 0  }
   0x6   :  { %s891_s23 = smov 0   ;;  %s893_s24 = smov 0  }
   0x7   :  { %s895_s25 = smov 0   ;;  %s897_s26 = smov 0  }
   0x8   :  { %s899_s27 = smov 0   ;;  %s901_s28 = smov 0  }
   0x9 LB: > { %1084 = sst [smem:[#allocation11_spill]] %s815_s21  ;;  %s550_s29 = sadd.s32 4294967295, %s843_s28   ;;  %s843_s28 = sphi %s901_s28, %s26_s28   ;;  %s839_s27 = sphi %s899_s27, %s1105_s27   ;;  %s835_s26 = sphi %s897_s26, %s1104_s26   ;;  %s831_s25 = sphi %s895_s25, %s1103_s25   ;;  %s827_s24 = sphi %s893_s24, %s1102_s24   ;;  %s823_s23 = sphi %s891_s23, %s1097_s23   ;;  %s819_s22 = sphi %s889_s22, %s1101_s22   ;;  %s815_s21 = sphi %s887_s21, %s1100_s21  }
   0xa   : > { %1085 = sst [smem:[#allocation12_spill]] %s823_s23  ;;  %s551_s30 = sadd.s32 4294967294, %s843_s28  }
   0xb   : > { %s35_s7 = sadd.s32 1, %s835_s26  ;;  %s38_s8 = sadd.s32 1, %s839_s27 }
   0xc   : > { %p36_p0 = scmp.ge.s32.totalorder %s35_s7, 2  ;;  %s47_s9 = sadd.s32 1, %s823_s23 }
   0xd   : > { %p54_p1 = scmp.ne.s32.totalorder %s823_s23, %s819_s22  ;;  %p55_p2 = scmp.eq.s32.totalorder %s843_s28, 0 }
   0xe   : > { %s1107_s7 = smov (%p36_p0, %s35_s7), 0  ;;  %s1109_s8 = smov (!%p36_p0, %s38_s8), %s839_s27 }
   0xf   : > { %1086 = sst [smem:[#allocation13_spill]] %s1107_s7  ;;  %s43_s10 = ssub.s32 %s835_s26, %s1107_s7 }
  0x10   : > { %p940_p3 = por %p55_p2, %p54_p1  ;;  %p40_p4 = scmp.ge.s32.totalorder %s1109_s8, 2 }
  0x11   : > { %p60_p5 = scmp.ne.s32.totalorder %s819_s22, %s815_s21  ;;  %p61_p6 = scmp.eq.s32.totalorder %s550_s29, 0 }
  0x12   : > { %p170_p7 = scmp.eq.s32.totalorder %s550_s29, 3  ;;  %s1111_s8 = smov (%p40_p4, %s1109_s8), 0 }
  0x13   : > { %1088 = sst [smem:[#allocation14_spill]] %s1111_s8  ;;  %p948_p8 = por %p61_p6, %p60_p5 }
  0x14   : > { %p952_p9 = por %p170_p7, %p54_p1  ;;  %s42_s14 = ssub.s32 %s839_s27, %s1111_s8 }
  0x15   : > { %p176_p10 = scmp.eq.s32.totalorder %s551_s30, 3  ;;  %s44_s15 = sor.u32 %s43_s10, %s42_s14 }
  0x16   : > { %p45_p11 = scmp.eq.s32.totalorder %s44_s15, 0  ;;  %p608_p13 = scmp.lt.s32.totalorder %s843_s28, 4 }
  0x17   : > { %p958_p12 = por %p176_p10, %p60_p5  ;;  %s236_s17 = sand.u32 1, %s823_s23  }
  0x18   : > { %s965_s18 = scalar_select %p45_p11, %s823_s23, %s47_s9  }
  0x19   : > { %s1091_s16 = scalar_select %p958_p12, 1, 0 }
  0x1a   : > { %1093 = sst [smem:[#allocation16_spill]] %s965_s18  ;;  %s554_s19 = sshll.u32 %s236_s17, 4 }
  0x1b   : > { %1092 = sst [smem:[#allocation15_spill]] %s1091_s16  ;;  %s555_s20 = sshll.u32 %s839_s27, 2 }
  0x1c   : > { %s244_s29 = sadd.s32 %s835_s26, %s555_s20  ;;  %s240_s7 = scalar_lea.vmem [#allocation2], %s554_s19 }
  0x1d   : > { %s249_s21 = sshll.u32 %s240_s7, 4  ;;  %s556_s8 = sshll.u32 %s244_s29, 3  ;;  %s250_s21 = int_to_ptr.vmem [resolvable:$true] %s249_s21 }
  0x1e   : > { %s246_s14 = scalar_lea.hbm %s1072_s0, %s556_s8  ;;  %p598_p0 = pnand %p608_p13, %p940_p3 }
  0x1f   : > { %s247_s15 = sshll.u32 %s246_s14, 4  ;;  %s237_s16 = scalar_lea.sflag [#allocation3], %s236_s17  ;;  %s248_s15 = int_to_ptr.hbm [resolvable:$true] %s247_s15 }
  0x20   : > { %s845_s9 = smov 256   ;;  %s846_s18 = smov 128  }
  0x21   : > { %s847_s23 = smov 8   ;;  %p557_p1 = scmp.ge.s32.totalorder %s843_s28, 1 }
  0x22   : > { %600 = dma.hbm_to_vmem [thread:$0]  (!%p598_p0), %s248_s15, 256, %s250_s21, %s237_s16, %s845_s9, %s846_s18, %s847_s23  }
  0x23   : > { %p257_p2 = scmp.lt.s32.totalorder %s843_s28, 5 }
  0x25   : > { %p258_p4 = pnand %p557_p1, %p257_p2 }
  0x26   : > { %s977_s7 = sand.u32 (!%p258_p4), 1, %s819_s22  }
  0x27   : > { %261 = sbr.rel (%p258_p4) target bundleno = 207 (0xcf), region = 40  ;;  %s558_s8 = sshll.u32 (!%p258_p4), %s977_s7, 4 }
  0x28   : > { %s264_s11 = scalar_lea.sflag (!%p258_p4), [#allocation3], %s977_s7  ;;  %s267_s19 = scalar_lea.vmem (!%p258_p4), [#allocation2], %s558_s8 }
  0x2c   : > { %802 = dma.done.wait (%p948_p8), %s264_s11, 256  }
  0x2d   : > { %804 = vsyncadd (%p948_p8), %s264_s11, 4294967040  ;;  %v848_v0 = vmov 0   ;;  %v303_v1 = vld [vmem:[%s267_s19] sm:$0xff]  ;;  %v304_v2 = vld [vmem:[%s267_s19 + $0x8] sm:$0xff]  ;;  %vm325_vm0 = vcmask 130048   ;;  %s573_s9 = sshll.u32 %s831_s25, 2 }
  0x2e   : > { %682 = vset.pattern.permute.xlu1 %v848_v0  ;;  %681 = vset.pattern.permute.xlu0 %v848_v0  ;;  %v305_v3 = vpack.c.bf16 %v304_v2, %v303_v1  ;;  %v345_v4 = vld [vmem:[%s1076_s4] sm:$0xff]  ;;  %v346_v8 = vld [vmem:[%s1076_s4 + $0x8] sm:$0xff]  ;;  %s403_s8 = sadd.s32 %s827_s24, %s573_s9  ;;  %s559_s11 = sshll.u32 %s977_s7, 3 }
  0x2f   : > { %v308_v5 = vld [vmem:[%s1074_s2] sm:$0xff]  ;;  %349 = vperm.xlu1 %682, %v345_v4   ;;  %v309_v9 = vld [vmem:[%s1074_s2 + $0x8] sm:$0xff]  ;;  %s574_s19 = sshll.u32 %s403_s8, 2  ;;  %s294_s17 = scalar_lea.vmem [#allocation5], %s559_s11 }
  0x30   : > { %v579_v6 = vld [vmem:[%s1073_s1] sm:$0xff]  ;;  %312 = vperm.xlu0 %681, %v308_v5   ;;  %336 = vmatpush.bf16.msra.mxu0 %v305_v3  ;;  %s405_s16 = scalar_lea.hbm %s1077_s5, %s574_s19  ;;  %s406_s18 = sshll.u32 %s294_s17, 4  ;;  %s1012_s18 = int_to_ptr.vmem [resolvable:$true] %s406_s18 }
  0x31   : > { %v580_v7 = vld [vmem:[%s1075_s3] sm:$0xff]  ;;  %372 = vmatpush.bf16.msra.mxu1 %v305_v3  ;;  %s301_s20 = scalar_lea.vmem [#allocation6], %s559_s11  ;;  %s423_s25 = scalar_lea.hbm %s1078_s6, %s574_s19 }
  0x32   : > { %s424_s12 = sshll.u32 %s301_s20, 4  ;;  %s408_s24 = sshll.u32 %s405_s16, 4  ;;  %s1014_s12 = int_to_ptr.vmem [resolvable:$true] %s424_s12  ;;  %s409_s24 = int_to_ptr.hbm [resolvable:$true] %s408_s24 }
  0x33   : > { %565 = vmatmul.msk.bf16.vlgmr.msra.gmra.mxu0 %vm325_vm0, %v579_v6  ;;  %s426_s10 = sshll.u32 %s423_s25, 4  ;;  %s388_s14 = scalar_lea.sflag [#allocation4], %s977_s7  ;;  %s1016_s10 = int_to_ptr.hbm [resolvable:$true] %s426_s10 }
  0x34   : > { %570 = vmatmul.msk.bf16.vlgmr.msra.gmra.mxu1 %vm325_vm0, %v580_v7  ;;  %s727_s15 = sshra.s32 %s409_s24, 4  ;;  %s733_s19 = scalar_lea.hbm %s1077_s5, 32  ;;  %s728_s15 = int_to_ptr.hbm [resolvable:$true] %s727_s15 }
  0x35   : > { %s729_s9 = scalar_lea.hbm %s728_s15, 8  ;;  %p734_p7 = scmp.lt.s32.totalorder %s728_s15, %s1077_s5 }
  0x36   : > { %p730_p3 = scmp.ne.s32.totalorder %s728_s15, %s729_s9  ;;  %p735_p8 = scmp.lt.s32.totalorder %s733_s19, %s729_s9 }
  0x37   : > { %354 = vperm.xlu1 %682, %v346_v8  }
  0x38   : > { %317 = vperm.xlu0 %681, %v309_v9   ;;  %p731_p5 = pnand %p730_p3, %p952_p9  ;;  %p736_p10 = por %p735_p8, %p734_p7 }
  0x3a   : > { %p732_p6 = pneg %p731_p5 }
  0x3c   : > { %p737_p11 = pnand %p736_p10, %p732_p6 }
  0xa1   : > { %v350_v10 = vpop.permute.xlu1 %349 }
  0xa2   : > { %v313_v11 = vpop.permute.xlu0 %312 }
  0xa9   : > { %v355_v14 = vpop.permute.xlu1 %354 }
  0xaa   : > { %v318_v15 = vpop.permute.xlu0 %317 }
  0xb0   : > { %v338_v12 = vpop.f32.mrf.mxu0 }
  0xb1   : > { %v374_v13 = vpop.f32.mrf.mxu1  ;;  %v339_v18 = vadd.f32 %v338_v12, %v313_v11 }
  0xb2   : > { %v375_v19 = vadd.f32 %v374_v13, %v350_v10 }
  0xb8   : > { %v340_v16 = vpop.f32.mrf.mxu0 }
  0xb9   : > { %v376_v17 = vpop.f32.mrf.mxu1  ;;  %v341_v20 = vadd.f32 %v340_v16, %v318_v15 }
  0xba   : > { %v377_v21 = vadd.f32 %v376_v17, %v355_v14 }
  0xbb   : > { %v584_v22 = vpack.c.bf16 %v341_v20, %v339_v18 }
  0xbc   : > { %v589_v23 = vpack.c.bf16 %v377_v21, %v375_v19 }
  0xbd   : > { %585 = vst [vmem:[%s294_s17] sm:$0xff] %v584_v22  }
  0xbe   : > { %590 = vst [vmem:[%s301_s20] sm:$0xff] %v589_v23  }
  0xbf   : > { %740 = shalt.err (!%p737_p11)
}
  0xc0   : > { %s849_s16 = smov 64   ;;  %s850_s17 = smov 128  }
  0xc1   : > { %s851_s20 = smov 4   ;;  %s393_s29 = scalar_lea.sflag [#allocation7], %s977_s7 }
  0xc2   : > { %593 = dma.vmem_to_hbm [thread:$0]  (%p952_p9), %s1012_s18, 128, %s409_s24, %s388_s14, %s849_s16, %s850_s17, %s851_s20  }
  0xc3   : > { %s755_s30 = sshra.s32 %s1016_s10, 4  ;;  %s761_s8 = scalar_lea.hbm %s1078_s6, 32  ;;  %s756_s30 = int_to_ptr.hbm [resolvable:$true] %s755_s30 }
  0xc4   : > { %s757_s25 = scalar_lea.hbm %s756_s30, 8  ;;  %p762_p2 = scmp.lt.s32.totalorder %s756_s30, %s1078_s6 }
  0xc5   : > { %p758_p13 = scmp.ne.s32.totalorder %s756_s30, %s757_s25  ;;  %p763_p4 = scmp.lt.s32.totalorder %s761_s8, %s757_s25 }
  0xc7   : > { %p759_p0 = pnand %p758_p13, %p952_p9  ;;  %p764_p3 = por %p763_p4, %p762_p2 }
  0xc9   : > { %p760_p1 = pneg %p759_p0 }
  0xcb   : > { %p765_p5 = pnand %p764_p3, %p760_p1 }
  0xcd   : > { %768 = shalt.err (!%p765_p5)
}
  0xce   : > { %594 = dma.vmem_to_hbm [thread:$0]  (%p952_p9), %s1014_s12, 128, %s1016_s10, %s393_s29, %s849_s16, %s850_s17, %s851_s20  }
  0xcf PF: > { %s1094_s7 = sld [smem:[#allocation11_spill]]  ;;  %p609_p6 = scmp.ge.s32.totalorder %s843_s28, 2 }
  0xd1   : > { %p602_p7 = pnand %p609_p6, %p958_p12 }
  0xd3   : > { %p603_p8 = pneg %p602_p7 }
  0xd5   : > { %s441_s24 = sand.u32 1, %s1094_s7  }
  0xd6   : > { %s442_s14 = scalar_lea.sflag [#allocation4], %s441_s24 }
  0xd7   : > { %806 = dma.done.wait (%p603_p8), %s442_s14, 128  }
  0xd8   : > { %808 = vsyncadd (%p603_p8), %s442_s14, 4294967168  ;;  %s452_s21 = scalar_lea.sflag [#allocation7], %s441_s24 }
  0xd9   : > { %810 = dma.done.wait (%p603_p8), %s452_s21, 128  }
  0xda   : > { %812 = vsyncadd (%p603_p8), %s452_s21, 4294967168  ;;  %s26_s28 = sadd.s32 1, %s843_s28   ;;  %s1096_s13 = sld [smem:[#allocation12_spill]] }
  0xdb   : > { %p23_p10 = scmp.ge.s32.totalorder %s26_s28, 6   ;;  %s1097_s23 = sld [smem:[#allocation16_spill]] }
  0xdc   : > { %s1098_s12 = sld [smem:[#allocation13_spill]]  ;;  %s1100_s21 = smov %s819_s22 }
  0xdd   : > { %s1099_s10 = sld [smem:[#allocation14_spill]]  ;;  %s1102_s24 = smov %s835_s26 }
  0xde   : > { %s1103_s25 = smov %s839_s27 }
  0xdf   :  { %25 = sbr.rel (!%p23_p10) target bundleno = 9 (0x9), region = 102 }
  0xe0   : > { %s1101_s22 = smov %s1096_s13 }
  0xe2   : > { %s1104_s26 = smov %s1098_s12 }
  0xe3   : > { %s1105_s27 = smov %s1099_s10 }
  0xe4   :  { %458 = vsyncpa [#allocation3], 1 }
  0xe5   :  { %460 = vsyncpa [#allocation3 + $0x1], 1 }
  0xe6   :  { %461 = vsyncpa [#allocation4], 1 }
  0xe7   :  { %463 = vsyncpa [#allocation4 + $0x1], 1 }
  0xe8   :  { %464 = vsyncpa [#allocation7], 1 }
  0xe9   :  { %466 = vsyncpa [#allocation7 + $0x1], 1 }

</bundles_post_ra>
